<compile_context>
chip_gen: v6e
topology: v6e:2x2x1
jax: 0.10.0
libtpu: 0.0.40
codegen_flags: <defaults>
</compile_context>

<pallas_src>
import functools
import math

import jax
import jax.numpy as jnp
import numpy as np
from jax import lax
from jax.experimental import pallas as pl
from jax.experimental.pallas import tpu as pltpu

LANE = 128
SUBLANE = 8


def _round_up(x, m):
    return (x + m - 1) // m * m


def _pad2(x, rows, cols):
    r, c = x.shape
    return jnp.pad(x, ((0, rows - r), (0, cols - c)))


def _dot(x, w):
    """MXU matmul: bf16 operands, f32 accumulation."""
    return jnp.dot(x.astype(jnp.bfloat16), w.astype(jnp.bfloat16),
                   preferred_element_type=jnp.float32)


def _apply_act(y, act):
    if act == "relu":
        return jnp.maximum(y, 0.0)
    if act == "sigmoid":
        return jax.nn.sigmoid(y)
    return y


def _onehot_rows(idx_col, n_src):
    """(n_out, 1) int32 row indices -> (n_out, n_src) bf16 one-hot matrix."""
    n_out = idx_col.shape[0]
    iota = lax.broadcasted_iota(jnp.int32, (n_out, n_src), 1)
    return jnp.where(idx_col == iota, 1.0, 0.0).astype(jnp.bfloat16)


def _neighbor_sum_max(a2b_ref, mb_bf, n_bonds_p, max_nb):
    """sum(nb) * max(nb) over a2b neighbour slots, via one-hot MXU gathers."""
    s = None
    m = None
    for k in range(max_nb):
        oh = _onehot_rows(a2b_ref[:, k:k + 1], n_bonds_p)
        g = jnp.dot(oh, mb_bf, preferred_element_type=jnp.float32)
        s = g if s is None else s + g
        m = g if m is None else jnp.maximum(m, g)
    return s * m


# ----------------------------------------------------------------------------
# Kernel 1: row-tiled linear  y = act(x @ W + b)
# ----------------------------------------------------------------------------
def _linear_kernel(x_ref, w_ref, b_ref, o_ref, *, act):
    y = _dot(x_ref[...], w_ref[...]) + b_ref[...]
    o_ref[...] = _apply_act(y, act)


def pallas_linear(x, w, b, act="none", row_tile=256):
    n, k = x.shape
    m = w.shape[1]
    tm = min(row_tile, _round_up(n, SUBLANE))
    n_p = _round_up(n, tm)
    if n_p != n:
        x = jnp.pad(x, ((0, n_p - n), (0, 0)))
    out = pl.pallas_call(
        functools.partial(_linear_kernel, act=act),
        grid=(n_p // tm,),
        in_specs=[
            pl.BlockSpec((tm, k), lambda i: (i, 0)),
            pl.BlockSpec((k, m), lambda i: (0, 0)),
            pl.BlockSpec((1, m), lambda i: (0, 0)),
        ],
        out_specs=pl.BlockSpec((tm, m), lambda i: (i, 0)),
        out_shape=jax.ShapeDtypeStruct((n_p, m), jnp.float32),
        compiler_params=pltpu.CompilerParams(
            dimension_semantics=("parallel",)),
    )(x, w, b.reshape(1, m))
    return out[:n] if n_p != n else out


# ----------------------------------------------------------------------------
# Kernel 2: fused message-passing depth loop (grid axis = depth step)
# Message state is carried directly in the grid-resident output refs.
# ----------------------------------------------------------------------------
def _mp_depth_kernel(a2b_ref, b2a_ref, b2revb_ref, ia_ref, ib_ref,
                     wh_ref, bh_ref, oa_ref, ob_ref,
                     *, n_atoms_p, n_bonds_p, max_nb):
    d = pl.program_id(0)

    @pl.when(d == 0)
    def _init():
        oa_ref[...] = ia_ref[...]          # message_atom <- input_atom
        ob_ref[...] = ib_ref[...]          # message_bond <- input_bond

    mb_bf = ob_ref[...].astype(jnp.bfloat16)

    # message_atom += sum(nb) * max(nb)   (vectorised one-hot MXU gathers)
    agg = _neighbor_sum_max(a2b_ref, mb_bf, n_bonds_p, max_nb)
    ma = oa_ref[...] + agg
    oa_ref[...] = ma

    # bond pre-activation: message_atom[b2a] - message_bond[b2revb]
    oh_b2a = _onehot_rows(b2a_ref[...], n_atoms_p)
    oh_rev = _onehot_rows(b2revb_ref[...], n_bonds_p)
    gat = (jnp.dot(oh_b2a, ma.astype(jnp.bfloat16),
                   preferred_element_type=jnp.float32)
           - jnp.dot(oh_rev, mb_bf, preferred_element_type=jnp.float32))

    # W_h matmul + residual + ReLU   (dropout == identity in eval)
    y = jnp.dot(gat.astype(jnp.bfloat16), wh_ref[0],
                preferred_element_type=jnp.float32)
    ob_ref[...] = jnp.maximum(ib_ref[...] + y + bh_ref[0], 0.0)


def pallas_mp_depth(a2b_mat, b2a_col, b2revb_col, input_atom, input_bond,
                    W_h, b_h):
    n_atoms_p, Hp = input_atom.shape
    n_bonds_p = input_bond.shape[0]
    max_nb = a2b_mat.shape[1]
    n_steps = W_h.shape[0]
    kernel = functools.partial(_mp_depth_kernel, n_atoms_p=n_atoms_p,
                               n_bonds_p=n_bonds_p, max_nb=max_nb)
    # TODO(synk): a second "parallel" row-block axis (for v7x megacore) is not
    # implemented; the depth axis must stay sequential because state is carried.
    return pl.pallas_call(
        kernel,
        grid=(n_steps,),
        in_specs=[
            pl.BlockSpec((n_atoms_p, max_nb), lambda d: (0, 0)),
            pl.BlockSpec((n_bonds_p, 1), lambda d: (0, 0)),
            pl.BlockSpec((n_bonds_p, 1), lambda d: (0, 0)),
            pl.BlockSpec((n_atoms_p, Hp), lambda d: (0, 0)),
            pl.BlockSpec((n_bonds_p, Hp), lambda d: (0, 0)),
            pl.BlockSpec((1, Hp, Hp), lambda d: (d, 0, 0)),
            pl.BlockSpec((1, 1, Hp), lambda d: (d, 0, 0)),
        ],
        out_specs=[
            pl.BlockSpec((n_atoms_p, Hp), lambda d: (0, 0)),
            pl.BlockSpec((n_bonds_p, Hp), lambda d: (0, 0)),
        ],
        out_shape=[jax.ShapeDtypeStruct((n_atoms_p, Hp), jnp.float32),
                   jax.ShapeDtypeStruct((n_bonds_p, Hp), jnp.float32)],
        compiler_params=pltpu.CompilerParams(
            dimension_semantics=("arbitrary",)),
    )(a2b_mat, b2a_col, b2revb_col, input_atom, input_bond, W_h, b_h)


# ----------------------------------------------------------------------------
# Kernel 3: final aggregation + fused K=3*Hp W_lr matmul + GRU bias+ReLU
# ----------------------------------------------------------------------------
def _final_agg_lr_kernel(a2b_ref, mb_ref, ma_ref, ia_ref, wlr_ref, blr_ref,
                         gb_ref, node_ref, msg_ref,
                         *, n_bonds_p, max_nb):
    mb_bf = mb_ref[...].astype(jnp.bfloat16)
    agg = _neighbor_sum_max(a2b_ref, mb_bf, n_bonds_p, max_nb)

    # y = cat([agg, message_atom, input_atom], 1) @ W_lr + b_lr  (single K=3Hp)
    cat = jnp.concatenate([agg, ma_ref[...], ia_ref[...]], axis=1)
    y = (jnp.dot(cat.astype(jnp.bfloat16), wlr_ref[...],
                 preferred_element_type=jnp.float32) + blr_ref[...])
    node_ref[...] = y                                      # BatchGRU "hidden"
    msg_ref[...] = jnp.maximum(y + gb_ref[...], 0.0)       # relu(node + bias)


def pallas_final_agg_lr(a2b_mat, message_bond, message_atom, input_atom,
                        W_lr, b_lr, gru_bias):
    n_atoms_p, Hp = message_atom.shape
    n_bonds_p = message_bond.shape[0]
    max_nb = a2b_mat.shape[1]
    kernel = functools.partial(_final_agg_lr_kernel, n_bonds_p=n_bonds_p,
                               max_nb=max_nb)
    return pl.pallas_call(
        kernel,
        grid=(1,),
        in_specs=[
            pl.BlockSpec((n_atoms_p, max_nb), lambda i: (0, 0)),
            pl.BlockSpec((n_bonds_p, Hp), lambda i: (0, 0)),
            pl.BlockSpec((n_atoms_p, Hp), lambda i: (0, 0)),
            pl.BlockSpec((n_atoms_p, Hp), lambda i: (0, 0)),
            pl.BlockSpec((3 * Hp, Hp), lambda i: (0, 0)),
            pl.BlockSpec((1, Hp), lambda i: (0, 0)),
            pl.BlockSpec((1, Hp), lambda i: (0, 0)),
        ],
        out_specs=[
            pl.BlockSpec((n_atoms_p, Hp), lambda i: (0, 0)),
            pl.BlockSpec((n_atoms_p, Hp), lambda i: (0, 0)),
        ],
        out_shape=[jax.ShapeDtypeStruct((n_atoms_p, Hp), jnp.float32),
                   jax.ShapeDtypeStruct((n_atoms_p, Hp), jnp.float32)],
    )(a2b_mat, message_bond, message_atom, input_atom,
      W_lr, b_lr.reshape(1, Hp), gru_bias.reshape(1, Hp))


# ----------------------------------------------------------------------------
# Kernel 4: bidirectional GRU — input projection hoisted, time loop in-kernel
# ----------------------------------------------------------------------------
def _bigru_kernel(x_ref, h0_ref, wih_ref, whh_ref, bih_ref, bhh_ref,
                  of_ref, ob_ref, xgf_ref, xgb_ref, *, T, B, Hp):
    # Hoisted input projection: one (T*B, Hp) @ (Hp, 3Hp) matmul per direction.
    x_all = x_ref[...].reshape(T * B, Hp).astype(jnp.bfloat16)
    xgf_ref[...] = (jnp.dot(x_all, wih_ref[0], preferred_element_type=jnp.float32)
                    + bih_ref[0]).reshape(T, B, 3 * Hp)
    xgb_ref[...] = (jnp.dot(x_all, wih_ref[1], preferred_element_type=jnp.float32)
                    + bih_ref[1]).reshape(T, B, 3 * Hp)

    def cell(xg, h, d):
        hg = (jnp.dot(h.astype(jnp.bfloat16), whh_ref[d],
                      preferred_element_type=jnp.float32) + bhh_ref[d])
        r = jax.nn.sigmoid(xg[:, :Hp] + hg[:, :Hp])
        z = jax.nn.sigmoid(xg[:, Hp:2 * Hp] + hg[:, Hp:2 * Hp])
        n = jnp.tanh(xg[:, 2 * Hp:] + r * hg[:, 2 * Hp:])
        return (1.0 - z) * n + z * h

    def step(t, carry):
        h_f, h_b = carry
        h_f = cell(xgf_ref[t], h_f, 0)                    # forward direction
        h_b = cell(xgb_ref[T - 1 - t], h_b, 1)            # backward direction
        of_ref[t] = h_f
        ob_ref[T - 1 - t] = h_b
        return (h_f, h_b)

    h0 = h0_ref[...]
    lax.fori_loop(0, T, step, (h0, h0))


def pallas_bigru(x_t, h0, p):
    T, B, Hp = x_t.shape
    kernel = functools.partial(_bigru_kernel, T=T, B=B, Hp=Hp)
    return pl.pallas_call(
        kernel,
        grid=(1,),
        in_specs=[
            pl.BlockSpec((T, B, Hp), lambda i: (0, 0, 0)),
            pl.BlockSpec((B, Hp), lambda i: (0, 0)),
            pl.BlockSpec((2, Hp, 3 * Hp), lambda i: (0, 0, 0)),
            pl.BlockSpec((2, Hp, 3 * Hp), lambda i: (0, 0, 0)),
            pl.BlockSpec((2, 1, 3 * Hp), lambda i: (0, 0, 0)),
            pl.BlockSpec((2, 1, 3 * Hp), lambda i: (0, 0, 0)),
        ],
        out_specs=[
            pl.BlockSpec((T, B, Hp), lambda i: (0, 0, 0)),
            pl.BlockSpec((T, B, Hp), lambda i: (0, 0, 0)),
        ],
        out_shape=[jax.ShapeDtypeStruct((T, B, Hp), jnp.float32),
                   jax.ShapeDtypeStruct((T, B, Hp), jnp.float32)],
        scratch_shapes=[pltpu.VMEM((T, B, 3 * Hp), jnp.float32),
                        pltpu.VMEM((T, B, 3 * Hp), jnp.float32)],
    )(x_t, h0, p["gru_Wih"], p["gru_Whh"], p["gru_bih"], p["gru_bhh"])


# ----------------------------------------------------------------------------
# Kernel 5: vectorised segment reduce (mean / max) via iota row masks
# ----------------------------------------------------------------------------
def _segment_reduce_kernel(starts_ref, sizes_ref, x_ref, o_ref, *, op, n_seg):
    x = x_ref[...]
    row_ids = lax.broadcasted_iota(jnp.int32, x.shape, 0)

    def seg_body(i, carry):
        start = starts_ref[i]
        size = sizes_ref[i]
        mask = (row_ids >= start) & (row_ids < start + size)
        if op == "max":
            red = jnp.max(jnp.where(mask, x, -jnp.inf), axis=0, keepdims=True)
        else:
            red = (jnp.sum(jnp.where(mask, x, 0.0), axis=0, keepdims=True)
                   / size.astype(jnp.float32))
        o_ref[pl.ds(i, 1), :] = red
        return carry

    lax.fori_loop(0, n_seg, seg_body, 0)


def pallas_segment_reduce(x, starts, sizes, op):
    n_seg = int(starts.shape[0])
    n_rows, Hp = x.shape
    n_rows_p = _round_up(n_rows, SUBLANE)
    if n_rows_p != n_rows:
        x = jnp.pad(x, ((0, n_rows_p - n_rows), (0, 0)))
    kernel = functools.partial(_segment_reduce_kernel, op=op, n_seg=n_seg)
    grid_spec = pltpu.PrefetchScalarGridSpec(
        num_scalar_prefetch=2,
        grid=(1,),
        in_specs=[pl.BlockSpec((n_rows_p, Hp), lambda i, st, sz: (0, 0))],
        out_specs=pl.BlockSpec((n_seg, Hp), lambda i, st, sz: (0, 0)),
    )
    return pl.pallas_call(
        kernel,
        grid_spec=grid_spec,
        out_shape=jax.ShapeDtypeStruct((n_seg, Hp), jnp.float32),
    )(starts, sizes, x)


# ----------------------------------------------------------------------------
# Model glue
# ----------------------------------------------------------------------------
def batch_gru(node, message, a_scope, p):
    """BatchGRU.forward: node/message (n_atoms_p, Hp) -> (n_atoms, 2*Hp)."""
    Hp = node.shape[1]
    T = max(sz for _, sz in a_scope)
    n_mols = len(a_scope)
    B_p = _round_up(n_mols, SUBLANE)

    starts = jnp.array([s for s, _ in a_scope], jnp.int32)
    sizes = jnp.array([sz for _, sz in a_scope], jnp.int32)

    # per-molecule initial hidden: segment max over node rows
    h0 = pallas_segment_reduce(node, starts, sizes, op="max")     # (n_mols, Hp)
    h0 = jnp.pad(h0, ((0, B_p - n_mols), (0, 0)))

    # pack per-molecule message rows -> (B_p, T, Hp) with one flat gather
    pack_idx = np.zeros((n_mols, T), np.int32)
    valid = np.zeros((n_mols, T, 1), np.float32)
    for i, (s, sz) in enumerate(a_scope):
        pack_idx[i, :sz] = np.arange(s, s + sz)
        valid[i, :sz, 0] = 1.0
    x = (jnp.take(message, jnp.asarray(pack_idx.reshape(-1)), axis=0)
         .reshape(n_mols, T, Hp) * jnp.asarray(valid))
    x = jnp.pad(x, ((0, B_p - n_mols), (0, 0), (0, 0)))
    x_t = jnp.swapaxes(x, 0, 1)                                    # (T, B_p, Hp)

    out_f, out_b = pallas_bigru(x_t, h0, p)
    out_f = jnp.swapaxes(out_f, 0, 1)[:n_mols].reshape(n_mols * T, Hp)
    out_b = jnp.swapaxes(out_b, 0, 1)[:n_mols].reshape(n_mols * T, Hp)

    # unpack GRU outputs back to atom rows (1..n_atoms-1) with flat gathers
    unpack_idx = np.concatenate(
        [i * T + np.arange(sz) for i, (_, sz) in enumerate(a_scope)]
    ).astype(np.int32)
    idx = jnp.asarray(unpack_idx)
    unpadded = jnp.concatenate([jnp.take(out_f, idx, axis=0),
                                jnp.take(out_b, idx, axis=0)], axis=1)
    first = jnp.concatenate([message[0:1], message[0:1]], axis=1)
    return jnp.concatenate([first, unpadded], axis=0)              # (n_atoms, 2Hp)


def cmpnn_forward(p, f_atoms, f_bonds, a2b_mat, b2a_col, b2revb_col, a_scope):
    # MPNEncoder input projections
    input_atom = pallas_linear(f_atoms, p["W_i_atom"], p["b_i_atom"], act="relu")
    input_bond = pallas_linear(f_bonds, p["W_i_bond"], p["b_i_bond"], act="relu")

    # Fused (depth-1)-step message passing, single pallas_call.
    if p["depth"] >= 2:
        message_atom, message_bond = pallas_mp_depth(
            a2b_mat, b2a_col, b2revb_col, input_atom, input_bond,
            p["W_h"], p["b_h"])
    else:
        message_atom, message_bond = input_atom, input_bond

    # Final aggregation + fused W_lr (+ GRU bias+ReLU).
    node, message = pallas_final_agg_lr(
        a2b_mat, message_bond, message_atom, input_atom,
        p["W_lr"], p["b_lr"], p["gru_bias"])

    # BatchGRU
    agg_message = batch_gru(node, message, a_scope, p)             # (n_atoms, 2Hp)
    atom_hiddens = pallas_linear(agg_message, p["W_o"], p["b_o"], act="relu")

    # Per-molecule mean readout.
    starts = jnp.array([s for s, _ in a_scope], jnp.int32)
    sizes = jnp.array([sz for _, sz in a_scope], jnp.int32)
    mol_vecs = pallas_segment_reduce(atom_hiddens, starts, sizes, op="mean")

    # FFN: [dropout, Linear, ReLU, dropout, Linear] then sigmoid (classif, eval)
    h1 = pallas_linear(mol_vecs, p["ffn_W1"], p["ffn_b1"], act="relu")
    out = pallas_linear(h1, p["ffn_W2"], p["ffn_b2"], act="sigmoid")
    return out[:, :p["dim_target"]]


# ----------------------------------------------------------------------------
# Parameters (xavier-normal weights, zero biases, as CMPNN.initialize_weights)
# Weights are zero-padded to lane-aligned shapes and stored in bf16 (MXU path);
# biases stay f32.  Zero padding keeps the padded model numerically identical.
# ----------------------------------------------------------------------------
def _xavier(key, shape):
    std = math.sqrt(2.0 / (shape[0] + shape[1]))
    return std * jax.random.normal(key, shape, dtype=jnp.float32)


def make_params(key, atom_fdim, bond_fdim, hidden, depth, dim_target):
    Hp = _round_up(hidden, LANE)
    Fa = _round_up(atom_fdim, LANE)
    Fb = _round_up(bond_fdim, LANE)
    Tp = _round_up(dim_target, LANE)
    n_wh = max(depth - 1, 1)

    keys = iter(jax.random.split(key, 64))
    nk = lambda: next(keys)
    zf = lambda n: jnp.zeros((n,), jnp.float32)

    def pad_w(w, rows, cols):
        return _pad2(w, rows, cols).astype(jnp.bfloat16)

    W_h = jnp.stack([pad_w(_xavier(nk(), (hidden, hidden)), Hp, Hp)
                     for _ in range(n_wh)], 0)                    # (n_wh,Hp,Hp)
    b_h = jnp.zeros((n_wh, 1, Hp), jnp.float32)

    # Fused K=3*Hp slab: rows [0:Hp) act on agg, [Hp:2Hp) on message_atom,
    # [2Hp:3Hp) on input_atom.
    W_lr = jnp.concatenate([pad_w(_xavier(nk(), (hidden, hidden)), Hp, Hp)
                            for _ in range(3)], axis=0)            # (3Hp,Hp)

    def gru_dir():
        wih = jnp.concatenate([pad_w(_xavier(nk(), (hidden, hidden)), Hp, Hp)
                               for _ in range(3)], axis=1)         # (Hp,3Hp)
        whh = jnp.concatenate([pad_w(_xavier(nk(), (hidden, hidden)), Hp, Hp)
                               for _ in range(3)], axis=1)
        return wih, whh

    wih_f, whh_f = gru_dir()
    wih_b, whh_b = gru_dir()

    W_o = jnp.concatenate([pad_w(_xavier(nk(), (hidden, hidden)), Hp, Hp),
                           pad_w(_xavier(nk(), (hidden, hidden)), Hp, Hp)],
                          axis=0)                                  # (2Hp,Hp)

    return {
        "hidden": hidden, "Hp": Hp, "depth": depth, "dim_target": dim_target,
        "W_i_atom": pad_w(_xavier(nk(), (atom_fdim, hidden)), Fa, Hp),
        "b_i_atom": zf(Hp),
        "W_i_bond": pad_w(_xavier(nk(), (bond_fdim, hidden)), Fb, Hp),
        "b_i_bond": zf(Hp),
        "W_h": W_h, "b_h": b_h,
        "W_lr": W_lr, "b_lr": zf(Hp),
        "gru_bias": zf(Hp),
        "gru_Wih": jnp.stack([wih_f, wih_b], 0),      # (2,Hp,3Hp) bf16
        "gru_Whh": jnp.stack([whh_f, whh_b], 0),
        "gru_bih": jnp.zeros((2, 1, 3 * Hp), jnp.float32),
        "gru_bhh": jnp.zeros((2, 1, 3 * Hp), jnp.float32),
        "W_o": W_o, "b_o": zf(Hp),
        "ffn_W1": pad_w(_xavier(nk(), (hidden, hidden)), Hp, Hp),
        "ffn_b1": zf(Hp),
        "ffn_W2": pad_w(_xavier(nk(), (hidden, dim_target)), Hp, Tp),
        "ffn_b2": zf(Tp),
    }


# ----------------------------------------------------------------------------
# Main: synthetic BatchMolGraph (2 molecules) + run
# ----------------------------------------------------------------------------
if __name__ == "__main__":
    ATOM_FDIM = 16
    BOND_FDIM = 24
    HIDDEN = 32
    DEPTH = 3
    DIM_TARGET = 1

    key = jax.random.PRNGKey(0)
    k_fa, k_fb, k_par = jax.random.split(key, 3)

    # molecule 1: 3 atoms (path 1-2-3), molecule 2: 4 atoms (ring 4-5-6-7)
    n_atoms = 1 + 3 + 4          # row 0 is the padding atom
    n_bonds = 1 + 4 + 8          # row 0 is the padding bond
    f_atoms = jax.random.normal(k_fa, (n_atoms, ATOM_FDIM), dtype=jnp.float32)
    f_atoms = f_atoms.at[0].set(0.0)
    f_bonds = jax.random.normal(k_fb, (n_bonds, BOND_FDIM), dtype=jnp.float32)
    f_bonds = f_bonds.at[0].set(0.0)

    a2b = jnp.array(
        [[0, 0],      # padding atom
         [2, 0],      # atom 1 <- bond 2 (2->1)
         [1, 4],      # atom 2 <- bonds 1 (1->2), 4 (3->2)
         [3, 0],      # atom 3 <- bond 3 (2->3)
         [6, 11],     # atom 4 <- bonds 6 (5->4), 11 (7->4)
         [5, 8],      # atom 5 <- bonds 5 (4->5), 8 (6->5)
         [7, 10],     # atom 6 <- bonds 7 (5->6), 10 (7->6)
         [9, 12]],    # atom 7 <- bonds 9 (6->7), 12 (4->7)
        dtype=jnp.int32)
    b2a = jnp.array([0, 1, 2, 2, 3, 4, 5, 5, 6, 6, 7, 7, 4], dtype=jnp.int32)
    b2revb = jnp.array([0, 2, 1, 4, 3, 6, 5, 8, 7, 10, 9, 12, 11], dtype=jnp.int32)
    a_scope = [(1, 3), (4, 4)]   # static Python metadata (chemprop convention)

    # Pad rows to multiples of 8 and feature dims to the 128-lane width.
    n_atoms_p = _round_up(n_atoms, SUBLANE)
    n_bonds_p = _round_up(n_bonds, SUBLANE)
    f_atoms_p = _pad2(f_atoms, n_atoms_p, _round_up(ATOM_FDIM, LANE))
    f_bonds_p = _pad2(f_bonds, n_bonds_p, _round_up(BOND_FDIM, LANE))

    a2b_mat = jnp.pad(a2b, ((0, n_atoms_p - n_atoms), (0, 0))).astype(jnp.int32)
    b2a_col = jnp.pad(b2a, (0, n_bonds_p - n_bonds)).astype(jnp.int32).reshape(-1, 1)
    b2revb_col = jnp.pad(b2revb, (0, n_bonds_p - n_bonds)).astype(jnp.int32).reshape(-1, 1)

    params = make_params(k_par, ATOM_FDIM, BOND_FDIM, HIDDEN, DEPTH, DIM_TARGET)

    # TODO(synk): training-mode dropout and the autograd/hook helper methods of
    # the reference module are not implemented (eval-mode forward only).
    out = cmpnn_forward(params, f_atoms_p, f_bonds_p, a2b_mat, b2a_col,
                        b2revb_col, a_scope)
    out = jax.block_until_ready(out)
    assert out.shape == (len(a_scope), DIM_TARGET)
    assert bool(jnp.all(jnp.isfinite(out)))
    print("KERNEL_OK")
</pallas_src>

<mosaic_0001>
module attributes {stable_mosaic.version = 11 : i64} {
  func.func @_linear_kernel(%arg0: i32, %arg1: memref<8x128xf32, #tpu.memory_space<vmem>>, %arg2: memref<128x128xbf16, #tpu.memory_space<vmem>>, %arg3: memref<1x128xf32, #tpu.memory_space<vmem>>, %arg4: memref<8x128xf32, #tpu.memory_space<vmem>>) attributes {dimension_semantics = [#tpu.dimension_semantics<parallel>], iteration_bounds = array<i64: 1>, scalar_prefetch = 0 : i64, scratch_operands = 0 : i64, tpu.core_type = #tpu.core_type<tc>, window_params = [{transform_indices = @transform_0, window_bounds = array<i64: 8, 128>}, {pipeline_mode = #tpu.pipeline_mode<synchronous>, transform_indices = @transform_1, window_bounds = array<i64: 128, 128>}, {pipeline_mode = #tpu.pipeline_mode<synchronous>, transform_indices = @transform_2, window_bounds = array<i64: 1, 128>}, {transform_indices = @transform_3, window_bounds = array<i64: 8, 128>}]} {
    %c0 = arith.constant 0 : index
    %c0_0 = arith.constant 0 : index
    %0 = vector.load %arg1[%c0, %c0_0] : memref<8x128xf32, #tpu.memory_space<vmem>>, vector<8x128xf32>
    %c0_1 = arith.constant 0 : index
    %c0_2 = arith.constant 0 : index
    %1 = vector.load %arg2[%c0_1, %c0_2] : memref<128x128xbf16, #tpu.memory_space<vmem>>, vector<128x128xbf16>
    %2 = arith.truncf %0 : vector<8x128xf32> to vector<8x128xbf16>
    %cst = arith.constant dense<0.000000e+00> : vector<8x128xf32>
    %3 = tpu.matmul %2, %1, %cst {dimension_numbers = #tpu.dot_dimension_numbers<[1], [0], [0], [1], [0, 0, 1, 1], [], []>} : vector<8x128xbf16>, vector<128x128xbf16>, vector<8x128xf32> -> vector<8x128xf32>
    %c0_3 = arith.constant 0 : index
    %c0_4 = arith.constant 0 : index
    %4 = vector.load %arg3[%c0_3, %c0_4] : memref<1x128xf32, #tpu.memory_space<vmem>>, vector<1x128xf32>
    %5 = vector.broadcast %4 : vector<1x128xf32> to vector<8x128xf32>
    %6 = arith.addf %3, %5 : vector<8x128xf32>
    %cst_5 = arith.constant 0.000000e+00 : f32
    %7 = vector.broadcast %cst_5 : f32 to vector<8x128xf32>
    %8 = arith.maximumf %6, %7 : vector<8x128xf32>
    %c0_6 = arith.constant 0 : index
    %c0_7 = arith.constant 0 : index
    %9 = vector.load %arg4[%c0_6, %c0_7] : memref<8x128xf32, #tpu.memory_space<vmem>>, vector<8x128xf32>
    tpu.vector_store %arg4[%c0_6, %c0_7], %8 {strides = array<i32>} : memref<8x128xf32, #tpu.memory_space<vmem>>, vector<8x128xf32>,
    return
  }
  func.func @transform_0(%arg0: i32) -> (i32, i32) {
    %c0_i32 = arith.constant 0 : i32
    %c0_i32_0 = arith.constant 0 : i32
    return %arg0, %c0_i32 : i32, i32
  }
  func.func @transform_1(%arg0: i32) -> (i32, i32) {
    %c0_i32 = arith.constant 0 : i32
    %c0_i32_0 = arith.constant 0 : i32
    %c0_i32_1 = arith.constant 0 : i32
    return %c0_i32, %c0_i32_0 : i32, i32
  }
  func.func @transform_2(%arg0: i32) -> (i32, i32) {
    %c0_i32 = arith.constant 0 : i32
    %c0_i32_0 = arith.constant 0 : i32
    %c0_i32_1 = arith.constant 0 : i32
    return %c0_i32, %c0_i32_0 : i32, i32
  }
  func.func @transform_3(%arg0: i32) -> (i32, i32) {
    %c0_i32 = arith.constant 0 : i32
    %c0_i32_0 = arith.constant 0 : i32
    return %arg0, %c0_i32 : i32, i32
  }
}

</mosaic_0001>

<bundles_post_ra>
// kernel: tpu_custom_call.1
= control target key start
LH: loop header
LB: loop body
LE: loop exit
PB: predicated region body
PF: predicated region fallthrough
CT: control target
= control target key end

     0   :  { %8 = vsyncpa [#allocation3], 0  ;;  %s331_s0 = inlined_call_operand.hbm [shape: f32[8,128], index: 0, kind: input, shape index: {}]   ;;  %s332_s1 = inlined_call_operand.hbm [shape: bf16[128,128], index: 1, kind: input, shape index: {}]   ;;  %s333_s2 = inlined_call_operand.vmem [shape: f32[1,128], index: 2, kind: input, shape index: {}]   ;;  %s334_s3 = inlined_call_operand.hbm [shape: f32[8,128], index: 3, kind: output, shape index: {}]  }
   0x1   :  { %9 = vsyncpa [#allocation6], 0 }
   0x2   :  { %10 = vsyncpa [#allocation4], 0  ;;  %s292_s12 = smov [#allocation2]   ;;  %s293_s14 = smov [#allocation5]  }
   0x3   :  { %s17_s13 = sshll.u32 %s292_s12, 4  ;;  %s26_s15 = sshll.u32 %s293_s14, 4  ;;  %s18_s13 = int_to_ptr.vmem [resolvable:$true] %s17_s13  ;;  %s27_s15 = int_to_ptr.vmem [resolvable:$true] %s26_s15 }
   0x4   :  { %s234_s16 = scalar_lea.vmem %s18_s13, 128  ;;  %p239_p1 = scmp.lt.s32.totalorder %s18_s13, %s18_s13 }
   0x5   :  { %p235_p0 = scmp.ne.s32.totalorder %s18_s13, %s234_s16  ;;  %p240_p2 = scmp.lt.s32.totalorder %s234_s16, %s234_s16 }
   0x7   :  { %p241_p3 = por %p240_p2, %p239_p1 }
   0x9   :  { %p242_p4 = pnand %p241_p3, %p235_p0 }
   0xb   :  { %245 = shalt.err (!%p242_p4)
}
   0xc   :  { %20 = dma.hbm_to_vmem [thread:$0]  %s331_s0, 128, %s18_s13, [#allocation3]  }
   0xd   :  { %s254_s19 = scalar_lea.vmem %s27_s15, 1024  ;;  %p259_p6 = scmp.lt.s32.totalorder %s27_s15, %s27_s15 }
   0xe   :  { %p255_p5 = scmp.ne.s32.totalorder %s27_s15, %s254_s19  ;;  %p260_p7 = scmp.lt.s32.totalorder %s254_s19, %s254_s19 }
  0x10   :  { %p261_p8 = por %p260_p7, %p259_p6 }
  0x12   :  { %p262_p9 = pnand %p261_p8, %p255_p5 }
  0x14   :  { %265 = shalt.err (!%p262_p9)
}
  0x15   :  { %s294_s20 = smov 64   ;;  %s295_s21 = smov 4  }
  0x16   :  { %32 = dma.hbm_to_vmem [thread:$0]  %s332_s1, 1024, %s27_s15, [#allocation6], %s294_s20, %s294_s20, %s295_s21  }
  0x17   :  { %286 = dma.done.wait [#allocation3], 128  }
  0x18   :  { %287 = vsyncadd [#allocation3], 4294967168 }
  0x19   :  { %288 = dma.done.wait [#allocation6], 1024  }
  0x1a   :  { %289 = vsyncadd [#allocation6], 4294966272  ;;  %v296_v0 = vmov 0.0   ;;  %vm297_vm0 = vmmov 0   ;;  %v218_v1 = vld [vmem:[#allocation5 + $0x38] sm:$0xff]   ;;  %v219_v2 = vld [vmem:[#allocation5 + $0x30] sm:$0xff]  }
  0x1b   :  { %191 = vmatprep.subr.bf16.mxu0 %v296_v0  ;;  %207 = vmatprep.mubr.msk.bf16.mxu0 %vm297_vm0, %v296_v0  ;;  %v220_v3 = vld [vmem:[#allocation5 + $0x28] sm:$0xff]   ;;  %v221_v4 = vld [vmem:[#allocation5 + $0x20] sm:$0xff]   ;;  %v222_v5 = vld [vmem:[#allocation5 + $0x18] sm:$0xff]   ;;  %s298_s24 = smov [#allocation7]  }
  0x1c   :  { %192 = vmatpush3.bf16.msra.mxu0 %v218_v1  ;;  %v223_v6 = vld [vmem:[#allocation5 + $0x10] sm:$0xff]   ;;  %v224_v7 = vld [vmem:[#allocation5 + $0x8] sm:$0xff]   ;;  %v225_v8 = vld [vmem:[#allocation5] sm:$0xff]   ;;  %s163_s25 = sshll.u32 %s298_s24, 4  ;;  %s164_s25 = int_to_ptr.vmem [resolvable:$true] %s163_s25 }
  0x1d   :  { %193 = vmatprep.subr.bf16.mxu0 %v296_v0  ;;  %v42_v9 = vld [vmem:[#allocation2] sm:$0xff]  ;;  %s266_s26 = scalar_lea.vmem %s164_s25, 128  ;;  %p271_p11 = scmp.lt.s32.totalorder %s164_s25, %s164_s25 }
  0x1e   :  { %v59_v10 = vpack.c.bf16 %v42_v9, %v42_v9  ;;  %v173_v11 = vld [vmem:[%s333_s2] ss:$0 sm:$0xff]  ;;  %p267_p10 = scmp.ne.s32.totalorder %s164_s25, %s266_s26  ;;  %p272_p12 = scmp.lt.s32.totalorder %s266_s26, %s266_s26 }
  0x20   :  { %194 = vmatpush3.bf16.msra.mxu0 %v219_v2  ;;  %p273_p13 = por %p272_p12, %p271_p11 }
  0x21   :  { %195 = vmatprep.subr.bf16.mxu0 %v296_v0 }
  0x22   :  { %p274_p0 = pnand %p273_p13, %p267_p10 }
  0x24   :  { %196 = vmatpush3.bf16.msra.mxu0 %v220_v3 }
  0x25   :  { %197 = vmatprep.subr.bf16.mxu0 %v296_v0 }
  0x28   :  { %198 = vmatpush3.bf16.msra.mxu0 %v221_v4 }
  0x29   :  { %199 = vmatprep.subr.bf16.mxu0 %v296_v0 }
  0x2c   :  { %200 = vmatpush3.bf16.msra.mxu0 %v222_v5 }
  0x2d   :  { %201 = vmatprep.subr.bf16.mxu0 %v296_v0 }
  0x30   :  { %202 = vmatpush3.bf16.msra.mxu0 %v223_v6 }
  0x31   :  { %203 = vmatprep.subr.bf16.mxu0 %v296_v0 }
  0x34   :  { %204 = vmatpush3.bf16.msra.mxu0 %v224_v7 }
  0x35   :  { %205 = vmatprep.subr.bf16.mxu0 %v296_v0 }
  0x38   :  { %206 = vmatpush3.bf16.msra.mxu0 %v225_v8 }
  0x3b   :  { %208 = vmatmul.mubr.bf16.vlgmr.msra.gmra.mxu0 %v59_v10 }
  0xfb   :  { %v149_v12 = vpop.f32.mrf.mxu0 }
  0xfc   :  { %v150_v13 = vadd.f32 %v173_v11, %v149_v12 }
  0xfd   :  { %v209_v14 = vpop.f32.mrf.mxu0 }
  0xfe   :  { %v155_v15 = vmax.f32 %v150_v13, 0.0 }
  0xff   :  { %v152_v16 = vpop.f32.mrf.mxu0 }
 0x100   :  { %156 = vst [vmem:[#allocation7] sm:$0xff] %v155_v15 }
 0x101   :  { %v210_v17 = vpop.f32.mrf.mxu0 }
 0x102   :  { %277 = shalt.err (!%p274_p0)
}
 0x103   :  { %166 = dma.vmem_to_hbm [thread:$0]  %s164_s25, 128, %s334_s3, [#allocation4]  }
 0x104   :  { %290 = dma.done.wait [#allocation4], 128  }
 0x105   :  { %291 = vsyncadd [#allocation4], 4294967168 }
 0x106   :  { %170 = vsyncpa [#allocation3], 1 }
 0x107   :  { %171 = vsyncpa [#allocation6], 1 }
 0x108   :  { %172 = vsyncpa [#allocation4], 1 }

</bundles_post_ra>
